<compile_context>
chip_gen: v6e
topology: v6e:2x2x1
jax: 0.10.0
libtpu: 0.0.40
codegen_flags: <defaults>
</compile_context>

<pallas_src>
import math

import jax
import jax.numpy as jnp
from jax.experimental import pallas as pl
from jax.experimental.pallas import tpu as pltpu

FEAT = 20
TM_MAX = 1024  # row-tile cap: amortizes per-grid-step overhead, ~160 KiB VMEM/tile


def _make_kernel(n_rows, tm, has_padding):
    """Build the kernel; n_rows / tm / has_padding are static trace-time values."""

    def kernel(x_ref, wc_ref, bc_ref, wt_ref, b_ref, out_ref):
        i = pl.program_id(0)

        @pl.when(i == 0)
        def _init():
            out_ref[0] = jnp.float32(0.0)
            out_ref[1] = jnp.float32(0.0)

        # h = relu(x @ (W.T @ R) + (b @ R + 1))   -- fused Linear + rand_weight
        h = jnp.dot(x_ref[...], wc_ref[...], preferred_element_type=jnp.float32)
        h = jnp.maximum(h + bc_ref[...], 0.0)
        # h = h @ W.T + b                          -- second (shared) Linear
        h = jnp.dot(h, wt_ref[...], preferred_element_type=jnp.float32) + b_ref[...]

        if has_padding:  # zero out padded rows so they don't affect the sums
            row = i * tm + jax.lax.broadcasted_iota(jnp.int32, (tm, 1), 0)
            h = jnp.where(row < n_rows, h, 0.0)

        out_ref[0] += jnp.sum(h)
        out_ref[1] += jnp.sum(h * h)

    return kernel


@jax.jit
def _device_forward(x, W, b, rand_weight):
    n = x.shape[0]
    wt = W.T                                   # (20, 20) reused by the kernel
    wc = jnp.dot(wt, rand_weight)              # fused first-two-matmul weight
    bc = (jnp.dot(b, rand_weight) + 1.0).reshape(1, FEAT)
    b2d = b.reshape(1, FEAT)

    tm = min(TM_MAX, max(8, -(-n // 8) * 8))   # multiple of 8, capped at TM_MAX
    n_pad = -(-n // tm) * tm
    if n_pad != n:
        x = jnp.pad(x, ((0, n_pad - n), (0, 0)))
    num_blocks = n_pad // tm

    out = pl.pallas_call(
        _make_kernel(n, tm, n_pad != n),
        out_shape=jax.ShapeDtypeStruct((2,), jnp.float32),
        grid=(num_blocks,),
        in_specs=[
            pl.BlockSpec((tm, FEAT), lambda i: (i, 0)),
            pl.BlockSpec((FEAT, FEAT), lambda i: (0, 0)),
            pl.BlockSpec((1, FEAT), lambda i: (0, 0)),
            pl.BlockSpec((FEAT, FEAT), lambda i: (0, 0)),
            pl.BlockSpec((1, FEAT), lambda i: (0, 0)),
        ],
        out_specs=pl.BlockSpec(
            (2,), lambda i: (0,), memory_space=pltpu.MemorySpace.SMEM),
        compiler_params=pltpu.CompilerParams(
            dimension_semantics=("arbitrary",)),
    )(x, wc, bc, wt, b2d)

    s, q = out[0], out[1]
    norm = jnp.sqrt(q)
    # while-loop body on the scalar sum: h /= 2, then maybe h *= 10 -> scale*sum(h)
    scale = jnp.where(norm * 0.5 < 0.8, 5.0, 0.5)
    return scale * s, norm


def fancy_mlp_forward(x, W, b, rand_weight):
    """Returns the scalar sum (device array) when ||h|| > 1, else None
    (matching the PyTorch module's implicit-None path)."""
    # TODO(synk): torch's print(x) debug statements are host-side I/O; omitted.
    result, norm = _device_forward(x, W, b, rand_weight)
    if float(norm) > 1.0:  # host sync only needed for the possibly-None return
        return result
    return None


if __name__ == "__main__":
    key = jax.random.PRNGKey(0)
    k_x, k_w, k_b, k_rw = jax.random.split(key, 4)

    batch = 8
    # Deterministic parameter init matching the torch shapes / init ranges:
    #   nn.Linear(20, 20): W, b ~ U(-1/sqrt(20), 1/sqrt(20))
    #   rand_weight: U[0, 1) of shape (20, 20)
    bound = 1.0 / math.sqrt(FEAT)
    W = jax.random.uniform(k_w, (FEAT, FEAT), jnp.float32, -bound, bound)
    b = jax.random.uniform(k_b, (FEAT,), jnp.float32, -bound, bound)
    rand_weight = jax.random.uniform(k_rw, (FEAT, FEAT), jnp.float32)
    x = jax.random.uniform(k_x, (batch, FEAT), jnp.float32)

    out = fancy_mlp_forward(x, W, b, rand_weight)

    # Pure-JAX reference of the module's forward (return-inside-while variant).
    h = x @ W.T + b
    h = jnp.maximum(h @ rand_weight + 1.0, 0.0)
    h = h @ W.T + b
    if float(jnp.linalg.norm(h)) > 1.0:
        h = h / 2.0
        if float(jnp.linalg.norm(h)) < 0.8:
            h = h * 10.0
        ref = jnp.sum(h)
    else:
        ref = None

    if out is not None:
        jax.block_until_ready(out)
        assert ref is not None
        assert abs(float(out) - float(ref)) <= 5e-3 * max(1.0, abs(float(ref)))
    else:
        assert ref is None
    print("KERNEL_OK")
</pallas_src>

<mosaic_0001>
module attributes {stable_mosaic.version = 11 : i64} {
  func.func @kernel(%arg0: i32, %arg1: memref<8x20xf32, #tpu.memory_space<vmem>>, %arg2: memref<20x20xf32, #tpu.memory_space<vmem>>, %arg3: memref<1x20xf32, #tpu.memory_space<vmem>>, %arg4: memref<20x20xf32, #tpu.memory_space<vmem>>, %arg5: memref<1x20xf32, #tpu.memory_space<vmem>>, %arg6: memref<2xf32, #tpu.memory_space<smem>>) attributes {dimension_semantics = [#tpu.dimension_semantics<arbitrary>], iteration_bounds = array<i64: 1>, scalar_prefetch = 0 : i64, scratch_operands = 0 : i64, tpu.core_type = #tpu.core_type<tc>, window_params = [{transform_indices = @transform_0, window_bounds = array<i64: 8, 20>}, {pipeline_mode = #tpu.pipeline_mode<synchronous>, transform_indices = @transform_1, window_bounds = array<i64: 20, 20>}, {pipeline_mode = #tpu.pipeline_mode<synchronous>, transform_indices = @transform_2, window_bounds = array<i64: 1, 20>}, {pipeline_mode = #tpu.pipeline_mode<synchronous>, transform_indices = @transform_3, window_bounds = array<i64: 20, 20>}, {pipeline_mode = #tpu.pipeline_mode<synchronous>, transform_indices = @transform_4, window_bounds = array<i64: 1, 20>}, {transform_indices = @transform_5, window_bounds = array<i64: 2>}]} {
    %c0_i32 = arith.constant 0 : i32
    %0 = arith.cmpi eq, %arg0, %c0_i32 : i32
    %1 = arith.extui %0 : i1 to i32
    %c0_i32_0 = arith.constant 0 : i32
    %2 = arith.cmpi ne, %1, %c0_i32_0 : i32
    scf.if %2 {
      %cst_17 = arith.constant 0.000000e+00 : f32
      %c0_18 = arith.constant 0 : index
      %31 = memref.load %arg6[%c0_18] : memref<2xf32, #tpu.memory_space<smem>>
      memref.store %cst_17, %arg6[%c0_18] : memref<2xf32, #tpu.memory_space<smem>>
      %cst_19 = arith.constant 0.000000e+00 : f32
      %c1_20 = arith.constant 1 : index
      %32 = memref.load %arg6[%c1_20] : memref<2xf32, #tpu.memory_space<smem>>
      memref.store %cst_19, %arg6[%c1_20] : memref<2xf32, #tpu.memory_space<smem>>
    } else {
    }
    %c0 = arith.constant 0 : index
    %c0_1 = arith.constant 0 : index
    %3 = vector.load %arg1[%c0, %c0_1] : memref<8x20xf32, #tpu.memory_space<vmem>>, vector<8x20xf32>
    %c0_2 = arith.constant 0 : index
    %c0_3 = arith.constant 0 : index
    %4 = vector.load %arg2[%c0_2, %c0_3] : memref<20x20xf32, #tpu.memory_space<vmem>>, vector<20x20xf32>
    %cst = arith.constant dense<0.000000e+00> : vector<8x20xf32>
    %5 = tpu.matmul %3, %4, %cst {dimension_numbers = #tpu.dot_dimension_numbers<[1], [0], [0], [1], [0, 0, 1, 1], [], []>} : vector<8x20xf32>, vector<20x20xf32>, vector<8x20xf32> -> vector<8x20xf32>
    %c0_4 = arith.constant 0 : index
    %c0_5 = arith.constant 0 : index
    %6 = vector.load %arg3[%c0_4, %c0_5] : memref<1x20xf32, #tpu.memory_space<vmem>>, vector<1x20xf32>
    %7 = vector.broadcast %6 : vector<1x20xf32> to vector<8x20xf32>
    %8 = arith.addf %5, %7 : vector<8x20xf32>
    %cst_6 = arith.constant 0.000000e+00 : f32
    %9 = vector.broadcast %cst_6 : f32 to vector<8x20xf32>
    %10 = arith.maximumf %8, %9 : vector<8x20xf32>
    %c0_7 = arith.constant 0 : index
    %c0_8 = arith.constant 0 : index
    %11 = vector.load %arg4[%c0_7, %c0_8] : memref<20x20xf32, #tpu.memory_space<vmem>>, vector<20x20xf32>
    %cst_9 = arith.constant dense<0.000000e+00> : vector<8x20xf32>
    %12 = tpu.matmul %10, %11, %cst_9 {dimension_numbers = #tpu.dot_dimension_numbers<[1], [0], [0], [1], [0, 0, 1, 1], [], []>} : vector<8x20xf32>, vector<20x20xf32>, vector<8x20xf32> -> vector<8x20xf32>
    %c0_10 = arith.constant 0 : index
    %c0_11 = arith.constant 0 : index
    %13 = vector.load %arg5[%c0_10, %c0_11] : memref<1x20xf32, #tpu.memory_space<vmem>>, vector<1x20xf32>
    %14 = vector.broadcast %13 : vector<1x20xf32> to vector<8x20xf32>
    %15 = arith.addf %12, %14 : vector<8x20xf32>
    %c0_12 = arith.constant 0 : index
    %16 = memref.load %arg6[%c0_12] : memref<2xf32, #tpu.memory_space<smem>>
    %17 = vector.shape_cast %15 : vector<8x20xf32> to vector<1x8x20xf32>
    %cst_13 = arith.constant dense<0.000000e+00> : vector<1xf32>
    %18 = vector.multi_reduction <add>, %17, %cst_13 [1, 2] : vector<1x8x20xf32> to vector<1xf32>
    %19 = vector.shape_cast %18 : vector<1xf32> to vector<1x1x1xf32>
    %20 = vector.extract %19[0, 0, 0] : f32 from vector<1x1x1xf32>
    %21 = arith.addf %16, %20 : f32
    %c0_14 = arith.constant 0 : index
    %22 = memref.load %arg6[%c0_14] : memref<2xf32, #tpu.memory_space<smem>>
    memref.store %21, %arg6[%c0_14] : memref<2xf32, #tpu.memory_space<smem>>
    %c1 = arith.constant 1 : index
    %23 = memref.load %arg6[%c1] : memref<2xf32, #tpu.memory_space<smem>>
    %24 = arith.mulf %15, %15 : vector<8x20xf32>
    %25 = vector.shape_cast %24 : vector<8x20xf32> to vector<1x8x20xf32>
    %cst_15 = arith.constant dense<0.000000e+00> : vector<1xf32>
    %26 = vector.multi_reduction <add>, %25, %cst_15 [1, 2] : vector<1x8x20xf32> to vector<1xf32>
    %27 = vector.shape_cast %26 : vector<1xf32> to vector<1x1x1xf32>
    %28 = vector.extract %27[0, 0, 0] : f32 from vector<1x1x1xf32>
    %29 = arith.addf %23, %28 : f32
    %c1_16 = arith.constant 1 : index
    %30 = memref.load %arg6[%c1_16] : memref<2xf32, #tpu.memory_space<smem>>
    memref.store %29, %arg6[%c1_16] : memref<2xf32, #tpu.memory_space<smem>>
    return
  }
  func.func @transform_0(%arg0: i32) -> (i32, i32) {
    %c0_i32 = arith.constant 0 : i32
    %c0_i32_0 = arith.constant 0 : i32
    return %arg0, %c0_i32 : i32, i32
  }
  func.func @transform_1(%arg0: i32) -> (i32, i32) {
    %c0_i32 = arith.constant 0 : i32
    %c0_i32_0 = arith.constant 0 : i32
    %c0_i32_1 = arith.constant 0 : i32
    return %c0_i32, %c0_i32_0 : i32, i32
  }
  func.func @transform_2(%arg0: i32) -> (i32, i32) {
    %c0_i32 = arith.constant 0 : i32
    %c0_i32_0 = arith.constant 0 : i32
    %c0_i32_1 = arith.constant 0 : i32
    return %c0_i32, %c0_i32_0 : i32, i32
  }
  func.func @transform_3(%arg0: i32) -> (i32, i32) {
    %c0_i32 = arith.constant 0 : i32
    %c0_i32_0 = arith.constant 0 : i32
    %c0_i32_1 = arith.constant 0 : i32
    return %c0_i32, %c0_i32_0 : i32, i32
  }
  func.func @transform_4(%arg0: i32) -> (i32, i32) {
    %c0_i32 = arith.constant 0 : i32
    %c0_i32_0 = arith.constant 0 : i32
    %c0_i32_1 = arith.constant 0 : i32
    return %c0_i32, %c0_i32_0 : i32, i32
  }
  func.func @transform_5(%arg0: i32) -> i32 {
    %c0_i32 = arith.constant 0 : i32
    %c0_i32_0 = arith.constant 0 : i32
    return %c0_i32 : i32
  }
}

</mosaic_0001>

<bundles_post_ra>
// kernel: _device_forward.1
= control target key start
LH: loop header
LB: loop body
LE: loop exit
PB: predicated region body
PF: predicated region fallthrough
CT: control target
= control target key end

     0   :  { %vm44_vm0 = vcmask 1043456   ;;  %v304_v1 = vmov 0.0   ;;  %vm305_vm1 = vmmov 0   ;;  %s373_s0 = inlined_call_operand.vmem [shape: f32[8,20], index: 0, kind: input, shape index: {}]   ;;  %s374_s1 = inlined_call_operand.vmem [shape: f32[20,20], index: 1, kind: input, shape index: {}]   ;;  %s375_s2 = inlined_call_operand.vmem [shape: f32[1,20], index: 2, kind: input, shape index: {}]   ;;  %s376_s3 = inlined_call_operand.vmem [shape: f32[20,20], index: 3, kind: input, shape index: {}]   ;;  %s377_s4 = inlined_call_operand.vmem [shape: f32[1,20], index: 4, kind: input, shape index: {}]   ;;  %s378_s5 = inlined_call_operand.vmem [shape: f32[2], index: 5, kind: output, shape index: {}]  }
   0x1   :  { %v32_v0 = vld [vmem:[%s374_s1 + $0x10] sm:$0xf]  ;;  %264 = vmatprep.subr.mxu0 %v304_v1  ;;  %v31_v2 = vld [vmem:[%s374_s1 + $0x8] sm:$0xff]  ;;  %273 = vmatprep.subr.mxu1 %v304_v1 }
   0x2   :  { %265 = vmatpush3.msk.msra.mxu0 %vm44_vm0, %v32_v0  ;;  %270 = vmatprep.mubr.msk.f32.mxu0 %vm305_vm1, %v304_v1 }
   0x3   :  { %10 = vsyncpa [#allocation3], 0  ;;  %266 = vmatprep.subr.mxu0 %v304_v1  ;;  %v30_v3 = vld [vmem:[%s374_s1] sm:$0xff]  ;;  %279 = vmatprep.mubr.msk.f32.mxu1 %vm305_vm1, %v304_v1  ;;  %vm40_vm2 = vcmask 162816   ;;  %v121_v5 = vld [vmem:[%s376_s3 + $0x10] sm:$0xf] }
   0x4   :  { %267 = vmatpush3.msra.mxu0 %v31_v2  ;;  %v29_v4 = vld [vmem:[%s373_s0] sm:$0xff]  ;;  %274 = vmatpush3.msk.msra.mxu1 %vm44_vm0, %v121_v5  ;;  %v120_v6 = vld [vmem:[%s376_s3 + $0x8] sm:$0xff]  ;;  %s240_s9 = sshll.u32 %s378_s5, 4  ;;  %s241_s9 = int_to_ptr.vmem [resolvable:$true] %s240_s9 }
   0x5   :  { %268 = vmatprep.subr.mxu0 %v304_v1  ;;  %275 = vmatprep.subr.mxu1 %v304_v1  ;;  %v119_v7 = vld [vmem:[%s376_s3] sm:$0xff]  ;;  %s290_s11 = scalar_lea.vmem %s241_s9, 16  ;;  %p295_p1 = scmp.lt.s32.totalorder %s241_s9, %s241_s9 }
   0x6   :  { %269 = vmatpush3.msra.mxu0 %v30_v3  ;;  %276 = vmatpush3.msra.mxu1 %v120_v6  ;;  %v249_v8 = vld [vmem:[%s375_s2] ss:$0 sm:$0xff]  ;;  %p291_p0 = scmp.ne.s32.totalorder %s241_s9, %s290_s11  ;;  %p296_p2 = scmp.lt.s32.totalorder %s290_s11, %s290_s11 }
   0x7   :  { %271 = vmatmul.mubr.msk.f32.vlgmr.msra.gmra.mxu0 %vm40_vm2, %v29_v4  ;;  %277 = vmatprep.subr.mxu1 %v304_v1  ;;  %v252_v13 = vld [vmem:[%s377_s4] ss:$0 sm:$0xff] }
   0x8   :  { %278 = vmatpush3.msra.mxu1 %v119_v7  ;;  %p297_p3 = por %p296_p2, %p295_p1 }
   0xa   :  { %p298_p4 = pnand %p297_p3, %p291_p0 }
  0xc7   :  { %v114_v9 = vpop.f32.mrf.mxu0 }
  0xc8   :  { %v115_v10 = vadd.f32 %v249_v8, %v114_v9 }
  0xc9   :  { %v272_v11 = vpop.f32.mrf.mxu0 }
  0xca   :  { %v118_v12 = vmax.f32 %v115_v10, 0.0 }
  0xcc   :  { %280 = vmatmul.mubr.msk.f32.vlgmr.msra.gmra.mxu1 %vm40_vm2, %v118_v12 }
 0x18c   :  { %v201_v14 = vpop.f32.mrf.mxu1 }
 0x18d   :  { %v202_v15 = vadd.f32 %v252_v13, %v201_v14 }
 0x18e   :  { %v281_v16 = vpop.f32.mrf.mxu1 }
 0x18f   :  { %v206_v17 = vsel %vm40_vm2, %v202_v15, 0.0  ;;  %v220_v18 = vmul.f32 %v202_v15, %v202_v15 }
 0x190   :  { %207 = vadd.xlane.f32.xlu0 %v206_v17 }
 0x191   :  { %v221_v19 = vsel %vm40_vm2, %v220_v18, 0.0 }
 0x194   :  { %222 = vadd.xlane.f32.xlu0 %v221_v19 }
 0x219   :  { %v208_v20 = vpop.xlane.xlu0 %207 }
 0x21a   :  { %v209_v21 = vrot.slane %v208_v20, 4 }
 0x21c   :  { %v210_v22 = vadd.f32 %v209_v21, %v208_v20 }
 0x21d   :  { %v223_v23 = vpop.xlane.xlu0 %222 }
 0x21e   :  { %v211_v24 = vrot.slane %v210_v22, 2  ;;  %v224_v25 = vrot.slane %v223_v23, 4 }
 0x220   :  { %v225_v26 = vadd.f32 %v224_v25, %v223_v23  ;;  %v212_v27 = vadd.f32 %v211_v24, %v210_v22 }
 0x222   :  { %v226_v28 = vrot.slane %v225_v26, 2  ;;  %v213_v29 = vrot.slane %v212_v27, 1 }
 0x224   :  { %v227_v30 = vadd.f32 %v226_v28, %v225_v26  ;;  %v214_v31 = vadd.f32 %v213_v29, %v212_v27 }
 0x226   :  { %282 = vpush %v214_v31  ;;  %v228_v32 = vrot.slane %v227_v30, 1 }
 0x228   :  { %v229_v33 = vadd.f32 %v228_v32, %v227_v30 }
 0x22a   :  { %284 = vpush %v229_v33 }
 0x257   :  { %s283_s2 = spop %282 }
 0x258   :  { %218 = sst [smem:[#allocation2]] %s283_s2 }
 0x25b   :  { %s285_s10 = spop %284 }
 0x25c   :  { %233 = sst [smem:[#allocation2 + $0x1]] %s285_s10 }
 0x25d   :  { %301 = shalt.err (!%p298_p4)
}
 0x25e   :  { %s306_s12 = smov [#allocation2]  }
 0x25f   :  { %243 = dma.smem_to_vmem %s306_s12, 16, %s241_s9, [#allocation3]  }
 0x260   :  { %302 = dma.done.wait [#allocation3], 16  }
 0x261   :  { %303 = vsyncadd [#allocation3], 4294967280 }
 0x262   :  { %247 = sfence }
 0x263   :  { %248 = vsyncpa [#allocation3], 1 }

</bundles_post_ra>
